<compile_context>
chip_gen: v6e
topology: v6e:2x2x1
jax: 0.10.0
libtpu: 0.0.40
codegen_flags: <defaults>
</compile_context>

<pallas_src>
import functools

import jax
import jax.numpy as jnp
from jax.experimental import pallas as pl
from jax.experimental.pallas import tpu as pltpu

EPS = 1e-5


def _round_up(x, m):
    return (x + m - 1) // m * m


def _pad2d(a, rows, cols):
    r, c = a.shape
    if r == rows and c == cols:
        return a
    return jnp.pad(a, ((0, rows - r), (0, cols - c)))


# ----------------------------------------------------------------------------
# Pallas kernels
# ----------------------------------------------------------------------------
def _bn_fused_kernel(x_ref, g_ref, b_ref, o_ref, *, inv_m, eps):
    """Single-block training-mode BN: batch stats + normalize in one pass."""
    x = x_ref[...]
    mean = jnp.sum(x, axis=0, keepdims=True) * inv_m
    var = jnp.sum(x * x, axis=0, keepdims=True) * inv_m - mean * mean
    var = jnp.maximum(var, 0.0)
    scale = g_ref[...] * jax.lax.rsqrt(var + eps)
    shift = b_ref[...] - mean * scale
    o_ref[...] = (x * scale + shift).astype(o_ref.dtype)


def _bn_stats_kernel(x_ref, o_ref):
    """Accumulate per-feature sum (row 0) and sum-of-squares (row 1)."""
    @pl.when(pl.program_id(0) == 0)
    def _():
        o_ref[...] = jnp.zeros_like(o_ref)

    x = x_ref[...]
    s = jnp.sum(x, axis=0, keepdims=True)
    sq = jnp.sum(x * x, axis=0, keepdims=True)
    pad = jnp.zeros((o_ref.shape[0] - 2, x.shape[1]), jnp.float32)
    o_ref[...] += jnp.concatenate([s, sq, pad], axis=0)


def _bn_apply_kernel(x_ref, s_ref, t_ref, o_ref):
    """Per-feature affine: y = x * scale + shift (lane-dense tiles)."""
    o_ref[...] = (x_ref[...] * s_ref[...] + t_ref[...]).astype(o_ref.dtype)


# ----------------------------------------------------------------------------
# Wrapper
# ----------------------------------------------------------------------------
def batch_norm_t(x, x_length, gamma, beta,
                 running_mean=None, running_var=None,
                 training=True, eps=EPS,
                 block_rows=256, max_fused_bytes=4 * 1024 * 1024):
    """BatchNormT forward.  x: (B, T, F).  Returns (y, x_length)."""
    B, T, F = x.shape
    M = B * T
    Fp = _round_up(F, 128)                       # lane-dense feature axis

    x2 = x.reshape(M, F).astype(jnp.float32)
    g = jnp.pad(gamma.astype(jnp.float32), (0, Fp - F)).reshape(1, Fp)
    bt = jnp.pad(beta.astype(jnp.float32), (0, Fp - F)).reshape(1, Fp)

    # ---- fused single-block path (stats + normalize, one HBM read of x) ----
    m8 = _round_up(M, 8)
    if training and m8 * Fp * 4 <= max_fused_bytes:
        xp = _pad2d(x2, m8, Fp)                  # zero pads don't perturb sums
        y = pl.pallas_call(
            functools.partial(_bn_fused_kernel, inv_m=1.0 / M, eps=eps),
            out_shape=jax.ShapeDtypeStruct((m8, Fp), jnp.float32),
            grid_spec=pltpu.PrefetchScalarGridSpec(
                num_scalar_prefetch=0, grid=(1,),
                in_specs=[pl.BlockSpec((m8, Fp), lambda i: (0, 0)),
                          pl.BlockSpec((1, Fp), lambda i: (0, 0)),
                          pl.BlockSpec((1, Fp), lambda i: (0, 0))],
                out_specs=pl.BlockSpec((m8, Fp), lambda i: (0, 0))),
            compiler_params=pltpu.CompilerParams(
                dimension_semantics=("arbitrary",)),
        )(xp, g, bt)
        return y[:M, :F].reshape(B, T, F).astype(x.dtype), x_length

    # ---- tiled two-pass path (large M): stats reduction + affine apply -----
    # Cap per-block VMEM (~2 MiB) so double-buffered tiles stay within the
    # default scoped VMEM limit on every TPU generation (incl. v7x's 64 MiB).
    tm_cap = max(8, ((2 * 1024 * 1024) // (Fp * 4)) // 8 * 8)
    tm = min(block_rows, tm_cap, m8)
    Mp = _round_up(M, tm)
    xp = _pad2d(x2, Mp, Fp)

    if training:
        stats = pl.pallas_call(
            _bn_stats_kernel,
            out_shape=jax.ShapeDtypeStruct((8, Fp), jnp.float32),
            grid_spec=pltpu.PrefetchScalarGridSpec(
                num_scalar_prefetch=0, grid=(Mp // tm,),
                in_specs=[pl.BlockSpec((tm, Fp), lambda i: (i, 0))],
                out_specs=pl.BlockSpec((8, Fp), lambda i: (0, 0))),
            compiler_params=pltpu.CompilerParams(
                dimension_semantics=("arbitrary",)),
        )(xp)
        mean = (stats[0] / M).reshape(1, Fp)
        var = jnp.maximum(stats[1] / M - mean * mean, 0.0)   # biased (train mode)
    else:
        rm = jnp.zeros((F,), jnp.float32) if running_mean is None else running_mean
        rv = jnp.ones((F,), jnp.float32) if running_var is None else running_var
        mean = jnp.pad(rm.astype(jnp.float32), (0, Fp - F)).reshape(1, Fp)
        var = jnp.pad(rv.astype(jnp.float32), (0, Fp - F),
                      constant_values=1.0).reshape(1, Fp)

    scale = g * jax.lax.rsqrt(var + eps)
    shift = bt - mean * scale

    y = pl.pallas_call(
        _bn_apply_kernel,
        out_shape=jax.ShapeDtypeStruct((Mp, Fp), jnp.float32),
        grid_spec=pltpu.PrefetchScalarGridSpec(
            num_scalar_prefetch=0, grid=(Mp // tm,),
            in_specs=[pl.BlockSpec((tm, Fp), lambda i: (i, 0)),
                      pl.BlockSpec((1, Fp), lambda i: (0, 0)),
                      pl.BlockSpec((1, Fp), lambda i: (0, 0))],
            out_specs=pl.BlockSpec((tm, Fp), lambda i: (i, 0))),
        compiler_params=pltpu.CompilerParams(
            dimension_semantics=("parallel",)),
    )(xp, scale, shift)
    return y[:M, :F].reshape(B, T, F).astype(x.dtype), x_length


class BatchNormT:
    """JAX/Pallas mirror of the PyTorch BatchNormT module (default: train mode)."""

    def __init__(self, num_features, eps=EPS):
        self.num_features = num_features
        self.eps = eps
        self.gamma = jnp.ones((num_features,), jnp.float32)
        self.beta = jnp.zeros((num_features,), jnp.float32)
        self.running_mean = jnp.zeros((num_features,), jnp.float32)
        self.running_var = jnp.ones((num_features,), jnp.float32)
        self.training = True

    def __call__(self, x, x_length):
        return batch_norm_t(x, x_length, self.gamma, self.beta,
                            self.running_mean, self.running_var,
                            training=self.training, eps=self.eps)


# ----------------------------------------------------------------------------
# Self-test
# ----------------------------------------------------------------------------
if __name__ == "__main__":
    key = jax.random.PRNGKey(0)
    k1, k2, k3, k4 = jax.random.split(key, 4)

    # Case 1: small (B, T, F) input -> fused single-block kernel (F padded to 128).
    B, T, F = 2, 16, 64
    x = jax.random.normal(k1, (B, T, F), jnp.float32)
    x_len = jnp.array([16, 12], dtype=jnp.int32)

    bn = BatchNormT(F)
    bn.gamma = 1.0 + 0.1 * jax.random.normal(k2, (F,), jnp.float32)
    bn.beta = 0.1 * jax.random.normal(k3, (F,), jnp.float32)

    y, y_len = bn(x, x_len)
    jax.block_until_ready(y)

    xm = x.reshape(B * T, F)
    mu, var = xm.mean(0), xm.var(0)                       # biased var (train mode)
    ref = ((xm - mu) * jax.lax.rsqrt(var + EPS) * bn.gamma + bn.beta).reshape(B, T, F)
    assert y.shape == (B, T, F)
    assert bool(jnp.all(jnp.isfinite(y)))
    assert jnp.allclose(y, ref, atol=1e-4, rtol=1e-4), float(jnp.max(jnp.abs(y - ref)))
    assert jnp.array_equal(y_len, x_len)

    # Case 2: force the tiled two-pass path (multi-tile grid, padded M and F).
    B2, T2, F2 = 4, 500, 200
    x2 = jax.random.normal(k4, (B2, T2, F2), jnp.float32)
    x2_len = jnp.full((B2,), T2, dtype=jnp.int32)
    y2, _ = batch_norm_t(x2, x2_len,
                         jnp.ones((F2,), jnp.float32), jnp.zeros((F2,), jnp.float32),
                         training=True, max_fused_bytes=0)
    jax.block_until_ready(y2)
    xm2 = x2.reshape(B2 * T2, F2)
    ref2 = ((xm2 - xm2.mean(0)) * jax.lax.rsqrt(xm2.var(0) + EPS)).reshape(B2, T2, F2)
    assert jnp.allclose(y2, ref2, atol=1e-4, rtol=1e-4), \
        float(jnp.max(jnp.abs(y2 - ref2)))

    print("KERNEL_OK")
</pallas_src>

<mosaic_0001>
module attributes {stable_mosaic.version = 11 : i64} {
  func.func @_bn_fused_kernel(%arg0: i32, %arg1: memref<32x128xf32, #tpu.memory_space<vmem>>, %arg2: memref<1x128xf32, #tpu.memory_space<vmem>>, %arg3: memref<1x128xf32, #tpu.memory_space<vmem>>, %arg4: memref<32x128xf32, #tpu.memory_space<vmem>>) attributes {dimension_semantics = [#tpu.dimension_semantics<arbitrary>], iteration_bounds = array<i64: 1>, scalar_prefetch = 0 : i64, scratch_operands = 0 : i64, tpu.core_type = #tpu.core_type<tc>, window_params = [{pipeline_mode = #tpu.pipeline_mode<synchronous>, transform_indices = @transform_0, window_bounds = array<i64: 32, 128>}, {pipeline_mode = #tpu.pipeline_mode<synchronous>, transform_indices = @transform_1, window_bounds = array<i64: 1, 128>}, {pipeline_mode = #tpu.pipeline_mode<synchronous>, transform_indices = @transform_2, window_bounds = array<i64: 1, 128>}, {pipeline_mode = #tpu.pipeline_mode<synchronous>, transform_indices = @transform_3, window_bounds = array<i64: 32, 128>}]} {
    %c0 = arith.constant 0 : index
    %c0_0 = arith.constant 0 : index
    %0 = vector.load %arg1[%c0, %c0_0] : memref<32x128xf32, #tpu.memory_space<vmem>>, vector<32x128xf32>
    %cst = arith.constant dense<0.000000e+00> : vector<128xf32>
    %1 = vector.multi_reduction <add>, %0, %cst [0] : vector<32x128xf32> to vector<128xf32>
    %2 = vector.shape_cast %1 : vector<128xf32> to vector<1x128xf32>
    %cst_1 = arith.constant 3.125000e-02 : f32
    %3 = vector.broadcast %cst_1 : f32 to vector<1x128xf32>
    %4 = arith.mulf %2, %3 : vector<1x128xf32>
    %5 = arith.mulf %0, %0 : vector<32x128xf32>
    %cst_2 = arith.constant dense<0.000000e+00> : vector<128xf32>
    %6 = vector.multi_reduction <add>, %5, %cst_2 [0] : vector<32x128xf32> to vector<128xf32>
    %7 = vector.shape_cast %6 : vector<128xf32> to vector<1x128xf32>
    %cst_3 = arith.constant 3.125000e-02 : f32
    %8 = vector.broadcast %cst_3 : f32 to vector<1x128xf32>
    %9 = arith.mulf %7, %8 : vector<1x128xf32>
    %10 = arith.mulf %4, %4 : vector<1x128xf32>
    %11 = arith.subf %9, %10 : vector<1x128xf32>
    %cst_4 = arith.constant 0.000000e+00 : f32
    %12 = vector.broadcast %cst_4 : f32 to vector<1x128xf32>
    %13 = arith.maximumf %11, %12 : vector<1x128xf32>
    %c0_5 = arith.constant 0 : index
    %c0_6 = arith.constant 0 : index
    %14 = vector.load %arg2[%c0_5, %c0_6] : memref<1x128xf32, #tpu.memory_space<vmem>>, vector<1x128xf32>
    %cst_7 = arith.constant 9.99999974E-6 : f32
    %15 = vector.broadcast %cst_7 : f32 to vector<1x128xf32>
    %16 = arith.addf %13, %15 : vector<1x128xf32>
    %17 = math.rsqrt %16 : vector<1x128xf32>
    %18 = arith.mulf %14, %17 : vector<1x128xf32>
    %c0_8 = arith.constant 0 : index
    %c0_9 = arith.constant 0 : index
    %19 = vector.load %arg3[%c0_8, %c0_9] : memref<1x128xf32, #tpu.memory_space<vmem>>, vector<1x128xf32>
    %20 = arith.mulf %4, %18 : vector<1x128xf32>
    %21 = arith.subf %19, %20 : vector<1x128xf32>
    %22 = vector.broadcast %18 : vector<1x128xf32> to vector<32x128xf32>
    %23 = arith.mulf %0, %22 : vector<32x128xf32>
    %24 = vector.broadcast %21 : vector<1x128xf32> to vector<32x128xf32>
    %25 = arith.addf %23, %24 : vector<32x128xf32>
    %c0_10 = arith.constant 0 : index
    %c0_11 = arith.constant 0 : index
    %26 = vector.load %arg4[%c0_10, %c0_11] : memref<32x128xf32, #tpu.memory_space<vmem>>, vector<32x128xf32>
    tpu.vector_store %arg4[%c0_10, %c0_11], %25 {strides = array<i32>} : memref<32x128xf32, #tpu.memory_space<vmem>>, vector<32x128xf32>,
    return
  }
  func.func @transform_0(%arg0: i32) -> (i32, i32) {
    %c0_i32 = arith.constant 0 : i32
    %c0_i32_0 = arith.constant 0 : i32
    %c0_i32_1 = arith.constant 0 : i32
    return %c0_i32, %c0_i32_0 : i32, i32
  }
  func.func @transform_1(%arg0: i32) -> (i32, i32) {
    %c0_i32 = arith.constant 0 : i32
    %c0_i32_0 = arith.constant 0 : i32
    %c0_i32_1 = arith.constant 0 : i32
    return %c0_i32, %c0_i32_0 : i32, i32
  }
  func.func @transform_2(%arg0: i32) -> (i32, i32) {
    %c0_i32 = arith.constant 0 : i32
    %c0_i32_0 = arith.constant 0 : i32
    %c0_i32_1 = arith.constant 0 : i32
    return %c0_i32, %c0_i32_0 : i32, i32
  }
  func.func @transform_3(%arg0: i32) -> (i32, i32) {
    %c0_i32 = arith.constant 0 : i32
    %c0_i32_0 = arith.constant 0 : i32
    %c0_i32_1 = arith.constant 0 : i32
    return %c0_i32, %c0_i32_0 : i32, i32
  }
}

</mosaic_0001>

<bundles_post_ra>
// kernel: tpu_custom_call.1
= control target key start
LH: loop header
LB: loop body
LE: loop exit
PB: predicated region body
PF: predicated region fallthrough
CT: control target
= control target key end

     0   :  { %8 = vsyncpa [#allocation3], 0  ;;  %s200_s0 = inlined_call_operand.hbm [shape: f32[32,128], index: 0, kind: input, shape index: {}]   ;;  %s201_s1 = inlined_call_operand.vmem [shape: f32[1,128], index: 1, kind: input, shape index: {}]   ;;  %s202_s2 = inlined_call_operand.vmem [shape: f32[1,128], index: 2, kind: input, shape index: {}]   ;;  %s203_s3 = inlined_call_operand.hbm [shape: f32[32,128], index: 3, kind: output, shape index: {}]  }
   0x1   :  { %9 = vsyncpa [#allocation4], 0  ;;  %s158_s12 = smov [#allocation2]  }
   0x2   :  { %s15_s13 = sshll.u32 %s158_s12, 4  ;;  %s16_s13 = int_to_ptr.vmem [resolvable:$true] %s15_s13 }
   0x3   :  { %s122_s14 = scalar_lea.vmem %s16_s13, 512  ;;  %p127_p1 = scmp.lt.s32.totalorder %s16_s13, %s16_s13 }
   0x4   :  { %p123_p0 = scmp.ne.s32.totalorder %s16_s13, %s122_s14  ;;  %p128_p2 = scmp.lt.s32.totalorder %s122_s14, %s122_s14 }
   0x6   :  { %p129_p3 = por %p128_p2, %p127_p1 }
   0x8   :  { %p130_p4 = pnand %p129_p3, %p123_p0 }
   0xa   :  { %133 = shalt.err (!%p130_p4)
}
   0xb   :  { %s159_s15 = smov 128   ;;  %s160_s16 = smov 8  }
   0xc   :  { %21 = dma.hbm_to_vmem [thread:$0]  %s200_s0, 512, %s16_s13, [#allocation3], %s159_s15, %s159_s15, %s160_s16  }
   0xd   :  { %154 = dma.done.wait [#allocation3], 512  }
   0xe   :  { %155 = vsyncadd [#allocation3], 4294966784  ;;  %v29_v0 = vld [vmem:[#allocation2] sm:$0xff]  ;;  %v30_v1 = vld [vmem:[#allocation2 + $0x8] sm:$0xff]  ;;  %v68_v32 = vlaneseq  ;;  %s161_s22 = smov [#allocation5]  }
   0xf   :  { %v31_v2 = vld [vmem:[#allocation2 + $0x10] sm:$0xff]  ;;  %v32_v3 = vld [vmem:[#allocation2 + $0x18] sm:$0xff]  ;;  %v33_v4 = vadd.f32 %v30_v1, %v29_v0  ;;  %v43_v5 = vmul.f32 %v29_v0, %v29_v0  ;;  %v44_v6 = vmul.f32 %v30_v1, %v30_v1  ;;  %v60_v34 = vld [vmem:[%s201_s1] sm:$0x1]  ;;  %s96_s23 = sshll.u32 %s161_s22, 4  ;;  %s97_s23 = int_to_ptr.vmem [resolvable:$true] %s96_s23 }
  0x10   :  { %v45_v7 = vmul.f32 %v31_v2, %v31_v2  ;;  %v46_v9 = vmul.f32 %v32_v3, %v32_v3  ;;  %v69_v33 = vshrl.u32 %v68_v32, 7  ;;  %v64_v38 = vld [vmem:[%s202_s2] sm:$0x1]  ;;  %s134_s1 = scalar_lea.vmem %s97_s23, 512  ;;  %p139_p6 = scmp.lt.s32.totalorder %s97_s23, %s97_s23 }
  0x11   :  { %v34_v8 = vadd.f32 %v33_v4, %v31_v2  ;;  %v47_v10 = vadd.f32 %v44_v6, %v43_v5  ;;  %p135_p5 = scmp.ne.s32.totalorder %s97_s23, %s134_s1  ;;  %p140_p7 = scmp.lt.s32.totalorder %s134_s1, %s134_s1 }
  0x12   :  { %v70_v35 = vsub.s32 0, %v69_v33 }
  0x13   :  { %v35_v11 = vadd.f32 %v34_v8, %v32_v3  ;;  %v48_v12 = vadd.f32 %v47_v10, %v45_v7  ;;  %p141_p8 = por %p140_p7, %p139_p6 }
  0x15   :  { %v36_v13 = vrot.slane %v35_v11, 4  ;;  %v49_v14 = vadd.f32 %v48_v12, %v46_v9  ;;  %p142_p9 = pnand %p141_p8, %p135_p5 }
  0x17   :  { %v37_v15 = vadd.f32 %v36_v13, %v35_v11  ;;  %v50_v16 = vrot.slane %v49_v14, 4 }
  0x19   :  { %v38_v17 = vrot.slane %v37_v15, 2  ;;  %v51_v18 = vadd.f32 %v50_v16, %v49_v14 }
  0x1b   :  { %v39_v19 = vadd.f32 %v38_v17, %v37_v15  ;;  %v52_v20 = vrot.slane %v51_v18, 2 }
  0x1d   :  { %v40_v21 = vrot.slane %v39_v19, 1  ;;  %v53_v22 = vadd.f32 %v52_v20, %v51_v18 }
  0x1f   :  { %v41_v23 = vadd.f32 %v40_v21, %v39_v19  ;;  %v54_v24 = vrot.slane %v53_v22, 1 }
  0x21   :  { %v42_v25 = vmul.f32 0.03125, %v41_v23  ;;  %v55_v26 = vadd.f32 %v54_v24, %v53_v22 }
  0x23   :  { %v56_v27 = vmul.f32 0.03125, %v55_v26  ;;  %v57_v28 = vmul.f32 %v42_v25, %v42_v25 }
  0x25   :  { %v58_v29 = vsub.f32 %v56_v27, %v57_v28 }
  0x27   :  { %v59_v30 = vmax.f32 %v58_v29, 0.0 }
  0x29   :  { %v61_v31 = vadd.f32 1e-05, %v59_v30 }
  0x2b   :  { %112 = vrsqrt.f32 %v61_v31 }
  0x38   :  { %v113_v36 = vpop.eup %112 }
  0x39   :  { %v63_v37 = vmul.f32 %v113_v36, %v60_v34 }
  0x3b   :  { %v65_v39 = vmul.f32 %v63_v37, %v42_v25  ;;  %v71_v40 = vrot.slane %v63_v37, %v70_v35 }
  0x3d   :  { %v66_v41 = vsub.f32 %v64_v38, %v65_v39  ;;  %v73_v42 = vmul.f32 %v71_v40, %v29_v0  ;;  %v74_v43 = vmul.f32 %v71_v40, %v30_v1  ;;  %v75_v44 = vmul.f32 %v71_v40, %v31_v2 }
  0x3e   :  { %v76_v45 = vmul.f32 %v71_v40, %v32_v3 }
  0x3f   :  { %v81_v46 = vrot.slane %v66_v41, %v70_v35 }
  0x41   :  { %v83_v47 = vadd.f32 %v81_v46, %v73_v42  ;;  %v84_v48 = vadd.f32 %v81_v46, %v74_v43  ;;  %v85_v49 = vadd.f32 %v81_v46, %v75_v44  ;;  %v86_v50 = vadd.f32 %v81_v46, %v76_v45 }
  0x43   :  { %87 = vst [vmem:[#allocation5] sm:$0xff] %v83_v47  ;;  %88 = vst [vmem:[#allocation5 + $0x8] sm:$0xff] %v84_v48 }
  0x44   :  { %89 = vst [vmem:[#allocation5 + $0x10] sm:$0xff] %v85_v49  ;;  %90 = vst [vmem:[#allocation5 + $0x18] sm:$0xff] %v86_v50 }
  0x45   :  { %145 = shalt.err (!%p142_p9)
}
  0x46   :  { %102 = dma.vmem_to_hbm [thread:$0]  %s97_s23, 512, %s203_s3, [#allocation4], %s159_s15, %s159_s15, %s160_s16  }
  0x47   :  { %156 = dma.done.wait [#allocation4], 512  }
  0x48   :  { %157 = vsyncadd [#allocation4], 4294966784 }
  0x49   :  { %106 = vsyncpa [#allocation3], 1 }
  0x4a   :  { %107 = vsyncpa [#allocation4], 1 }

</bundles_post_ra>
